<compile_context>
chip_gen: v5e
topology: v5e:2x2
jax: 0.10.0
libtpu: 0.0.40
codegen_flags: <defaults>
</compile_context>

<pallas_src>
import functools

import jax
import jax.numpy as jnp
from jax.experimental import pallas as pl
from jax.experimental.pallas import tpu as pltpu


def _limbs_kernel(p_ref, o_ref, *, min_length):
    """p: [6, TS, 128]  ->  o: [10, TS, 128].

    Input rows (over the flattened B*M axis): p0x, p0y, p0z, p1x, p1y, p1z.
    Output rows: mux, muy, muz, R00, R11, R22, yy, yz, yy*yz*k, clamp(|d|^2).
    The remaining rho entries are sign flips / duplicates assembled in the
    wrapper (R01=-yy, R10=yy, R02=-yz, R20=yz, R12=R21=-yy*yz*k).
    """
    p0x, p0y, p0z = p_ref[0], p_ref[1], p_ref[2]
    p1x, p1y, p1z = p_ref[3], p_ref[4], p_ref[5]

    # --- not_inverse_kinematics: midpoint + half-difference direction -------
    o_ref[0] = 0.5 * (p0x + p1x)
    o_ref[1] = 0.5 * (p0y + p1y)
    o_ref[2] = 0.5 * (p0z + p1z)

    dx = 0.5 * (p1x - p0x)
    dy = 0.5 * (p1y - p0y)
    dz = 0.5 * (p1z - p0z)
    sq_len = dx * dx + dy * dy + dz * dz

    # --- vector_rotation(e=(1,0,0), d): Rodrigues rotation of x-axis onto ---
    # --- d/|d|.  Exact sqrt/division: kernel is HBM-bound, approx EUP ops ---
    # --- buy nothing and their error is amplified near yx == -1.          ---
    norm = jnp.sqrt(sq_len)
    yx = dx / norm
    yy = dy / norm
    yz = dz / norm

    # TODO(synk): singular for zero-length or anti-parallel (yx == -1) limbs
    # (NaN/Inf) — inherited from the reference; padded lanes (sq_len == 0)
    # produce NaNs that are sliced off in the wrapper.
    k = 1.0 / (1.0 + yx)
    yyk = yy * k
    yzk = yz * k
    yy_yz_k = yy * yzk

    o_ref[3] = 1.0 - (yy * yyk + yz * yzk)      # R00
    o_ref[4] = 1.0 - yy * yyk                   # R11
    o_ref[5] = 1.0 - yz * yzk                   # R22
    o_ref[6] = yy                               # R10 ( = -R01 )
    o_ref[7] = yz                               # R20 ( = -R02 )
    o_ref[8] = yy_yz_k                          # -R12 ( = -R21 )

    # --- clamped squared length: only batch-dependent lambd plane -----------
    o_ref[9] = jnp.maximum(sq_len, min_length * min_length)


def pose3d_to_limbs(points, edges, widths, min_length=0.001):
    """points: [*, N, 3, 1] f32;  widths: [M, 1, 1] f32;  edges: static tuple of (i, j).

    Returns (mu [*, M, 3, 1], rho [*, M, 3, 3], lambd [*, M, 3, 1]).
    """
    assert min_length > 0.0
    *lead, N, _, _ = points.shape
    B = 1
    for d in lead:
        B *= int(d)
    M = len(edges)
    L = B * M

    # --- single gather + single transpose into coordinate-first [6, B*M] ----
    pts = points.reshape(B, N, 3).astype(jnp.float32)
    idx = jnp.asarray([[e[0] for e in edges], [e[1] for e in edges]], dtype=jnp.int32)  # [2, M]
    gathered = pts[:, idx, :]                                     # [B, 2, M, 3]
    p = jnp.transpose(gathered, (1, 3, 0, 2)).reshape(6, L)       # rows: p0x p0y p0z p1x p1y p1z

    # --- lane/sublane-dense packing: flat index -> (sublane row, lane) -------
    s_rows = -(-L // 128)                        # sublane rows needed
    rows8 = -(-s_rows // 8) * 8                  # rounded up to full vregs
    ts0 = min(512, rows8)                        # <=512: ~8 MiB double-buffered, fits v5e default VMEM
    steps = -(-rows8 // ts0)
    if rows8 >= 16:
        steps = max(steps, 2)                    # v7x megacore: give both TensorCores work
    TS = -(-(-(-rows8 // steps)) // 8) * 8       # ceil(rows8/steps) rounded up to 8
    S = steps * TS                               # padded rows (multiple of TS, minimal waste)
    L_pad = S * 128
    p = jnp.pad(p, ((0, 0), (0, L_pad - L))).reshape(6, S, 128)

    out = pl.pallas_call(
        functools.partial(_limbs_kernel, min_length=float(min_length)),
        out_shape=jax.ShapeDtypeStruct((10, S, 128), jnp.float32),
        grid=(steps,),
        in_specs=[pl.BlockSpec((6, TS, 128), lambda i: (0, i, 0))],
        out_specs=pl.BlockSpec((10, TS, 128), lambda i: (0, i, 0)),
        compiler_params=pltpu.CompilerParams(dimension_semantics=("parallel",)),
    )(p)

    # --- back to the PyTorch conventions (thin XLA relayout) -----------------
    out = out.reshape(10, L_pad)[:, :L].reshape(10, B, M)
    mu = jnp.transpose(out[0:3], (1, 2, 0))[..., None]            # [B, M, 3, 1]

    r00, r11, r22 = out[3], out[4], out[5]
    ryy, ryz, ryzk = out[6], out[7], out[8]
    rho = jnp.stack(
        [r00, -ryy, -ryz,
         ryy, r11, -ryzk,
         ryz, -ryzk, r22], axis=-1).reshape(B, M, 3, 3)

    sq = out[9]
    w2 = jnp.broadcast_to(jnp.reshape(widths.astype(jnp.float32), (1, M)) ** 2, (B, M))
    lambd = jnp.stack([sq, w2, w2], axis=-1)[..., None]           # [B, M, 3, 1]

    mu = mu.reshape(*lead, M, 3, 1)
    rho = rho.reshape(*lead, M, 3, 3)
    lambd = lambd.reshape(*lead, M, 3, 1)
    return mu, rho, lambd


def _reference(points, edges, widths, min_length=0.001):
    """Pure-JAX reference for a sanity check."""
    pts = jnp.squeeze(points, axis=-1)
    idx0 = jnp.asarray([e[0] for e in edges])
    idx1 = jnp.asarray([e[1] for e in edges])
    p0, p1 = pts[:, idx0, :], pts[:, idx1, :]                      # [B, M, 3]
    mu = 0.5 * (p0 + p1)
    d = 0.5 * (p1 - p0)
    sq_len = jnp.sum(d * d, axis=-1, keepdims=True)                # [B, M, 1]
    y = d / jnp.sqrt(sq_len)
    yx, yy, yz = y[..., 0], y[..., 1], y[..., 2]
    k = 1.0 / (1.0 + yx)
    rho = jnp.stack([
        1.0 - (yy * yy + yz * yz) * k, -yy, -yz,
        yy, 1.0 - yy * yy * k, -yy * yz * k,
        yz, -yy * yz * k, 1.0 - yz * yz * k,
    ], axis=-1).reshape(*yx.shape, 3, 3)
    w2 = jnp.broadcast_to(jnp.reshape(widths, (1, -1, 1)) ** 2, sq_len.shape)
    lambd = jnp.concatenate(
        [jnp.maximum(sq_len, min_length ** 2), w2, w2], axis=-1)[..., None]
    return mu[..., None], rho, lambd


if __name__ == "__main__":
    B, N = 2, 8
    edges = ((0, 1), (1, 2), (2, 3), (0, 4), (4, 5), (5, 6), (6, 7))
    M = len(edges)

    key = jax.random.PRNGKey(0)
    points = jax.random.normal(key, (B, N, 3, 1), dtype=jnp.float32)
    widths = (0.05 + 0.01 * jnp.arange(M, dtype=jnp.float32)).reshape(M, 1, 1)

    mu, rho, lambd = pose3d_to_limbs(points, edges, widths)
    jax.block_until_ready((mu, rho, lambd))

    assert mu.shape == (B, M, 3, 1) and rho.shape == (B, M, 3, 3) and lambd.shape == (B, M, 3, 1)

    mu_r, rho_r, lam_r = _reference(points, edges, widths)
    assert jnp.allclose(mu, mu_r, atol=1e-3), "mu mismatch"
    assert jnp.allclose(rho, rho_r, atol=1e-3, rtol=1e-3), "rho mismatch"
    assert jnp.allclose(lambd, lam_r, atol=1e-3, rtol=1e-3), "lambd mismatch"

    print("KERNEL_OK")
</pallas_src>

<mosaic_0001>
module attributes {stable_mosaic.version = 11 : i64} {
  func.func @_limbs_kernel(%arg0: i32, %arg1: memref<6x8x128xf32, #tpu.memory_space<vmem>>, %arg2: memref<10x8x128xf32, #tpu.memory_space<vmem>>) attributes {dimension_semantics = [#tpu.dimension_semantics<parallel>], iteration_bounds = array<i64: 1>, scalar_prefetch = 0 : i64, scratch_operands = 0 : i64, tpu.core_type = #tpu.core_type<tc>, window_params = [{transform_indices = @transform_0, window_bounds = array<i64: 6, 8, 128>}, {transform_indices = @transform_1, window_bounds = array<i64: 10, 8, 128>}]} {
    %c0 = arith.constant 0 : index
    %c0_0 = arith.constant 0 : index
    %c0_1 = arith.constant 0 : index
    %0 = vector.load %arg1[%c0, %c0_0, %c0_1] : memref<6x8x128xf32, #tpu.memory_space<vmem>>, vector<1x8x128xf32>
    %1 = vector.shape_cast %0 : vector<1x8x128xf32> to vector<8x128xf32>
    %c1 = arith.constant 1 : index
    %c0_2 = arith.constant 0 : index
    %c0_3 = arith.constant 0 : index
    %2 = vector.load %arg1[%c1, %c0_2, %c0_3] : memref<6x8x128xf32, #tpu.memory_space<vmem>>, vector<1x8x128xf32>
    %3 = vector.shape_cast %2 : vector<1x8x128xf32> to vector<8x128xf32>
    %c2 = arith.constant 2 : index
    %c0_4 = arith.constant 0 : index
    %c0_5 = arith.constant 0 : index
    %4 = vector.load %arg1[%c2, %c0_4, %c0_5] : memref<6x8x128xf32, #tpu.memory_space<vmem>>, vector<1x8x128xf32>
    %5 = vector.shape_cast %4 : vector<1x8x128xf32> to vector<8x128xf32>
    %c3 = arith.constant 3 : index
    %c0_6 = arith.constant 0 : index
    %c0_7 = arith.constant 0 : index
    %6 = vector.load %arg1[%c3, %c0_6, %c0_7] : memref<6x8x128xf32, #tpu.memory_space<vmem>>, vector<1x8x128xf32>
    %7 = vector.shape_cast %6 : vector<1x8x128xf32> to vector<8x128xf32>
    %c4 = arith.constant 4 : index
    %c0_8 = arith.constant 0 : index
    %c0_9 = arith.constant 0 : index
    %8 = vector.load %arg1[%c4, %c0_8, %c0_9] : memref<6x8x128xf32, #tpu.memory_space<vmem>>, vector<1x8x128xf32>
    %9 = vector.shape_cast %8 : vector<1x8x128xf32> to vector<8x128xf32>
    %c5 = arith.constant 5 : index
    %c0_10 = arith.constant 0 : index
    %c0_11 = arith.constant 0 : index
    %10 = vector.load %arg1[%c5, %c0_10, %c0_11] : memref<6x8x128xf32, #tpu.memory_space<vmem>>, vector<1x8x128xf32>
    %11 = vector.shape_cast %10 : vector<1x8x128xf32> to vector<8x128xf32>
    %12 = arith.addf %1, %7 : vector<8x128xf32>
    %cst = arith.constant 5.000000e-01 : f32
    %13 = vector.broadcast %cst : f32 to vector<8x128xf32>
    %14 = arith.mulf %13, %12 : vector<8x128xf32>
    %c0_12 = arith.constant 0 : index
    %c0_13 = arith.constant 0 : index
    %c0_14 = arith.constant 0 : index
    %15 = vector.load %arg2[%c0_12, %c0_13, %c0_14] : memref<10x8x128xf32, #tpu.memory_space<vmem>>, vector<1x8x128xf32>
    %16 = vector.shape_cast %15 : vector<1x8x128xf32> to vector<8x128xf32>
    %17 = vector.shape_cast %14 : vector<8x128xf32> to vector<1x8x128xf32>
    tpu.vector_store %arg2[%c0_12, %c0_13, %c0_14], %17 {strides = array<i32>} : memref<10x8x128xf32, #tpu.memory_space<vmem>>, vector<1x8x128xf32>,
    %18 = arith.addf %3, %9 : vector<8x128xf32>
    %cst_15 = arith.constant 5.000000e-01 : f32
    %19 = vector.broadcast %cst_15 : f32 to vector<8x128xf32>
    %20 = arith.mulf %19, %18 : vector<8x128xf32>
    %c1_16 = arith.constant 1 : index
    %c0_17 = arith.constant 0 : index
    %c0_18 = arith.constant 0 : index
    %21 = vector.load %arg2[%c1_16, %c0_17, %c0_18] : memref<10x8x128xf32, #tpu.memory_space<vmem>>, vector<1x8x128xf32>
    %22 = vector.shape_cast %21 : vector<1x8x128xf32> to vector<8x128xf32>
    %23 = vector.shape_cast %20 : vector<8x128xf32> to vector<1x8x128xf32>
    tpu.vector_store %arg2[%c1_16, %c0_17, %c0_18], %23 {strides = array<i32>} : memref<10x8x128xf32, #tpu.memory_space<vmem>>, vector<1x8x128xf32>,
    %24 = arith.addf %5, %11 : vector<8x128xf32>
    %cst_19 = arith.constant 5.000000e-01 : f32
    %25 = vector.broadcast %cst_19 : f32 to vector<8x128xf32>
    %26 = arith.mulf %25, %24 : vector<8x128xf32>
    %c2_20 = arith.constant 2 : index
    %c0_21 = arith.constant 0 : index
    %c0_22 = arith.constant 0 : index
    %27 = vector.load %arg2[%c2_20, %c0_21, %c0_22] : memref<10x8x128xf32, #tpu.memory_space<vmem>>, vector<1x8x128xf32>
    %28 = vector.shape_cast %27 : vector<1x8x128xf32> to vector<8x128xf32>
    %29 = vector.shape_cast %26 : vector<8x128xf32> to vector<1x8x128xf32>
    tpu.vector_store %arg2[%c2_20, %c0_21, %c0_22], %29 {strides = array<i32>} : memref<10x8x128xf32, #tpu.memory_space<vmem>>, vector<1x8x128xf32>,
    %30 = arith.subf %7, %1 : vector<8x128xf32>
    %cst_23 = arith.constant 5.000000e-01 : f32
    %31 = vector.broadcast %cst_23 : f32 to vector<8x128xf32>
    %32 = arith.mulf %31, %30 : vector<8x128xf32>
    %33 = arith.subf %9, %3 : vector<8x128xf32>
    %cst_24 = arith.constant 5.000000e-01 : f32
    %34 = vector.broadcast %cst_24 : f32 to vector<8x128xf32>
    %35 = arith.mulf %34, %33 : vector<8x128xf32>
    %36 = arith.subf %11, %5 : vector<8x128xf32>
    %cst_25 = arith.constant 5.000000e-01 : f32
    %37 = vector.broadcast %cst_25 : f32 to vector<8x128xf32>
    %38 = arith.mulf %37, %36 : vector<8x128xf32>
    %39 = arith.mulf %32, %32 : vector<8x128xf32>
    %40 = arith.mulf %35, %35 : vector<8x128xf32>
    %41 = arith.addf %39, %40 : vector<8x128xf32>
    %42 = arith.mulf %38, %38 : vector<8x128xf32>
    %43 = arith.addf %41, %42 : vector<8x128xf32>
    %44 = math.sqrt %43 : vector<8x128xf32>
    %45 = arith.divf %32, %44 : vector<8x128xf32>
    %46 = arith.divf %35, %44 : vector<8x128xf32>
    %47 = arith.divf %38, %44 : vector<8x128xf32>
    %cst_26 = arith.constant 1.000000e+00 : f32
    %48 = vector.broadcast %cst_26 : f32 to vector<8x128xf32>
    %49 = arith.addf %48, %45 : vector<8x128xf32>
    %cst_27 = arith.constant 1.000000e+00 : f32
    %50 = vector.broadcast %cst_27 : f32 to vector<8x128xf32>
    %51 = arith.divf %50, %49 : vector<8x128xf32>
    %52 = arith.mulf %46, %51 : vector<8x128xf32>
    %53 = arith.mulf %47, %51 : vector<8x128xf32>
    %54 = arith.mulf %46, %53 : vector<8x128xf32>
    %55 = arith.mulf %46, %52 : vector<8x128xf32>
    %56 = arith.mulf %47, %53 : vector<8x128xf32>
    %57 = arith.addf %55, %56 : vector<8x128xf32>
    %cst_28 = arith.constant 1.000000e+00 : f32
    %58 = vector.broadcast %cst_28 : f32 to vector<8x128xf32>
    %59 = arith.subf %58, %57 : vector<8x128xf32>
    %c3_29 = arith.constant 3 : index
    %c0_30 = arith.constant 0 : index
    %c0_31 = arith.constant 0 : index
    %60 = vector.load %arg2[%c3_29, %c0_30, %c0_31] : memref<10x8x128xf32, #tpu.memory_space<vmem>>, vector<1x8x128xf32>
    %61 = vector.shape_cast %60 : vector<1x8x128xf32> to vector<8x128xf32>
    %62 = vector.shape_cast %59 : vector<8x128xf32> to vector<1x8x128xf32>
    tpu.vector_store %arg2[%c3_29, %c0_30, %c0_31], %62 {strides = array<i32>} : memref<10x8x128xf32, #tpu.memory_space<vmem>>, vector<1x8x128xf32>,
    %63 = arith.mulf %46, %52 : vector<8x128xf32>
    %cst_32 = arith.constant 1.000000e+00 : f32
    %64 = vector.broadcast %cst_32 : f32 to vector<8x128xf32>
    %65 = arith.subf %64, %63 : vector<8x128xf32>
    %c4_33 = arith.constant 4 : index
    %c0_34 = arith.constant 0 : index
    %c0_35 = arith.constant 0 : index
    %66 = vector.load %arg2[%c4_33, %c0_34, %c0_35] : memref<10x8x128xf32, #tpu.memory_space<vmem>>, vector<1x8x128xf32>
    %67 = vector.shape_cast %66 : vector<1x8x128xf32> to vector<8x128xf32>
    %68 = vector.shape_cast %65 : vector<8x128xf32> to vector<1x8x128xf32>
    tpu.vector_store %arg2[%c4_33, %c0_34, %c0_35], %68 {strides = array<i32>} : memref<10x8x128xf32, #tpu.memory_space<vmem>>, vector<1x8x128xf32>,
    %69 = arith.mulf %47, %53 : vector<8x128xf32>
    %cst_36 = arith.constant 1.000000e+00 : f32
    %70 = vector.broadcast %cst_36 : f32 to vector<8x128xf32>
    %71 = arith.subf %70, %69 : vector<8x128xf32>
    %c5_37 = arith.constant 5 : index
    %c0_38 = arith.constant 0 : index
    %c0_39 = arith.constant 0 : index
    %72 = vector.load %arg2[%c5_37, %c0_38, %c0_39] : memref<10x8x128xf32, #tpu.memory_space<vmem>>, vector<1x8x128xf32>
    %73 = vector.shape_cast %72 : vector<1x8x128xf32> to vector<8x128xf32>
    %74 = vector.shape_cast %71 : vector<8x128xf32> to vector<1x8x128xf32>
    tpu.vector_store %arg2[%c5_37, %c0_38, %c0_39], %74 {strides = array<i32>} : memref<10x8x128xf32, #tpu.memory_space<vmem>>, vector<1x8x128xf32>,
    %c6 = arith.constant 6 : index
    %c0_40 = arith.constant 0 : index
    %c0_41 = arith.constant 0 : index
    %75 = vector.load %arg2[%c6, %c0_40, %c0_41] : memref<10x8x128xf32, #tpu.memory_space<vmem>>, vector<1x8x128xf32>
    %76 = vector.shape_cast %75 : vector<1x8x128xf32> to vector<8x128xf32>
    %77 = vector.shape_cast %46 : vector<8x128xf32> to vector<1x8x128xf32>
    tpu.vector_store %arg2[%c6, %c0_40, %c0_41], %77 {strides = array<i32>} : memref<10x8x128xf32, #tpu.memory_space<vmem>>, vector<1x8x128xf32>,
    %c7 = arith.constant 7 : index
    %c0_42 = arith.constant 0 : index
    %c0_43 = arith.constant 0 : index
    %78 = vector.load %arg2[%c7, %c0_42, %c0_43] : memref<10x8x128xf32, #tpu.memory_space<vmem>>, vector<1x8x128xf32>
    %79 = vector.shape_cast %78 : vector<1x8x128xf32> to vector<8x128xf32>
    %80 = vector.shape_cast %47 : vector<8x128xf32> to vector<1x8x128xf32>
    tpu.vector_store %arg2[%c7, %c0_42, %c0_43], %80 {strides = array<i32>} : memref<10x8x128xf32, #tpu.memory_space<vmem>>, vector<1x8x128xf32>,
    %c8 = arith.constant 8 : index
    %c0_44 = arith.constant 0 : index
    %c0_45 = arith.constant 0 : index
    %81 = vector.load %arg2[%c8, %c0_44, %c0_45] : memref<10x8x128xf32, #tpu.memory_space<vmem>>, vector<1x8x128xf32>
    %82 = vector.shape_cast %81 : vector<1x8x128xf32> to vector<8x128xf32>
    %83 = vector.shape_cast %54 : vector<8x128xf32> to vector<1x8x128xf32>
    tpu.vector_store %arg2[%c8, %c0_44, %c0_45], %83 {strides = array<i32>} : memref<10x8x128xf32, #tpu.memory_space<vmem>>, vector<1x8x128xf32>,
    %cst_46 = arith.constant 9.99999997E-7 : f32
    %84 = vector.broadcast %cst_46 : f32 to vector<8x128xf32>
    %85 = arith.maximumf %43, %84 : vector<8x128xf32>
    %c9 = arith.constant 9 : index
    %c0_47 = arith.constant 0 : index
    %c0_48 = arith.constant 0 : index
    %86 = vector.load %arg2[%c9, %c0_47, %c0_48] : memref<10x8x128xf32, #tpu.memory_space<vmem>>, vector<1x8x128xf32>
    %87 = vector.shape_cast %86 : vector<1x8x128xf32> to vector<8x128xf32>
    %88 = vector.shape_cast %85 : vector<8x128xf32> to vector<1x8x128xf32>
    tpu.vector_store %arg2[%c9, %c0_47, %c0_48], %88 {strides = array<i32>} : memref<10x8x128xf32, #tpu.memory_space<vmem>>, vector<1x8x128xf32>,
    return
  }
  func.func @transform_0(%arg0: i32) -> (i32, i32, i32) {
    %c0_i32 = arith.constant 0 : i32
    %c0_i32_0 = arith.constant 0 : i32
    %c0_i32_1 = arith.constant 0 : i32
    return %c0_i32, %arg0, %c0_i32_0 : i32, i32, i32
  }
  func.func @transform_1(%arg0: i32) -> (i32, i32, i32) {
    %c0_i32 = arith.constant 0 : i32
    %c0_i32_0 = arith.constant 0 : i32
    %c0_i32_1 = arith.constant 0 : i32
    return %c0_i32, %arg0, %c0_i32_0 : i32, i32, i32
  }
}

</mosaic_0001>

<bundles_post_ra>
// kernel: tpu_custom_call.1
= control target key start
LH: loop header
LB: loop body
LE: loop exit
PB: predicated region body
PF: predicated region fallthrough
CT: control target
= control target key end

     0   :  { %6 = vsyncpa [#allocation3], 0  ;;  %s234_s0 = inlined_call_operand.hbm [shape: f32[6,8,128], index: 0, kind: input, shape index: {}]   ;;  %s235_s1 = inlined_call_operand.hbm [shape: f32[10,8,128], index: 1, kind: output, shape index: {}]  }
   0x1   :  { %7 = vsyncpa [#allocation4], 0  ;;  %s12_s8 = sshll.u32 %s234_s0, 4  ;;  %s208_s9 = smov [#allocation2]   ;;  %s13_s8 = int_to_ptr.hbm [resolvable:$true] %s12_s8 }
   0x2   :  { %s14_s10 = sshll.u32 %s208_s9, 4  ;;  %s209_s11 = smov 128   ;;  %s15_s10 = int_to_ptr.vmem [resolvable:$true] %s14_s10 }
   0x3   :  { %s210_s12 = smov 8  }
   0x4   :  { %20 = dma.hbm_to_vmem [thread:$0]  %s13_s8, 768, %s15_s10, [#allocation3], %s209_s11, %s209_s11, %s210_s12  }
   0x5   :  { %204 = dma.done.wait [#allocation3], 768  }
   0x6   :  { %205 = vsyncadd [#allocation3], 4294966528  ;;  %v25_v0 = vld [vmem:[#allocation2] sm:$0xff]  ;;  %v31_v1 = vld [vmem:[#allocation2 + $0x18] sm:$0xff]  ;;  %s211_s0 = smov [#allocation5]   ;;  %s133_s16 = sshll.u32 %s235_s1, 4  ;;  %s134_s16 = int_to_ptr.hbm [resolvable:$true] %s133_s16 }
   0x7   :  { %v27_v2 = vld [vmem:[#allocation2 + $0x8] sm:$0xff]  ;;  %v36_v3 = vadd.f32 %v31_v1, %v25_v0  ;;  %v47_v4 = vsub.f32 %v31_v1, %v25_v0  ;;  %v33_v5 = vld [vmem:[#allocation2 + $0x20] sm:$0xff]  ;;  %v29_v6 = vld [vmem:[#allocation2 + $0x10] sm:$0xff]  ;;  %s131_s13 = sshll.u32 %s211_s0, 4  ;;  %s132_s13 = int_to_ptr.vmem [resolvable:$true] %s131_s13 }
   0x8   :  { %v35_v7 = vld [vmem:[#allocation2 + $0x28] sm:$0xff]  ;;  %v39_v8 = vadd.f32 %v33_v5, %v27_v2  ;;  %v49_v9 = vsub.f32 %v33_v5, %v27_v2 }
   0x9   :  { %v43_v10 = vadd.f32 %v35_v7, %v29_v6  ;;  %v51_v11 = vsub.f32 %v35_v7, %v29_v6  ;;  %v37_v12 = vmul.f32 0.5, %v36_v3  ;;  %v48_v13 = vmul.f32 0.5, %v47_v4 }
   0xa   :  { %v40_v14 = vmul.f32 0.5, %v39_v8  ;;  %v50_v15 = vmul.f32 0.5, %v49_v9 }
   0xb   :  { %v44_v16 = vmul.f32 0.5, %v43_v10  ;;  %v52_v17 = vmul.f32 0.5, %v51_v11  ;;  %38 = vst [vmem:[#allocation5] sm:$0xff] %v37_v12  ;;  %v53_v18 = vmul.f32 %v48_v13, %v48_v13 }
   0xc   :  { %42 = vst [vmem:[#allocation5 + $0x8] sm:$0xff] %v40_v14  ;;  %v54_v19 = vmul.f32 %v50_v15, %v50_v15 }
   0xd   :  { %v56_v20 = vmul.f32 %v52_v17, %v52_v17  ;;  %46 = vst [vmem:[#allocation5 + $0x10] sm:$0xff] %v44_v16 }
   0xe   :  { %v55_v21 = vadd.f32 %v54_v19, %v53_v18 }
  0x10   :  { %v57_v22 = vadd.f32 %v56_v20, %v55_v21 }
  0x12   :  { %150 = vrsqrt.f32 %v57_v22  ;;  %vm65_vm0 = vcmp.eq.f32.partialorder %v57_v22, inf  ;;  %v68_v29 = vand.u32 2147483648, %v57_v22  ;;  %vm67_vm1 = vcmp.eq.f32.partialorder %v57_v22, 0.0 }
  0x13   :  { %v124_v40 = vmax.f32 %v57_v22, 1e-06 }
  0x15   :  { %126 = vst [vmem:[#allocation5 + $0x48] sm:$0xff] %v124_v40 }
  0x18   :  { %v151_v23 = vpop.eup %150 }
  0x19   :  { %v59_v24 = vmul.f32 %v151_v23, %v57_v22 }
  0x1b   :  { %v60_v25 = vmul.f32 %v151_v23, %v59_v24 }
  0x1d   :  { %v61_v26 = vmul.f32 0.5, %v60_v25 }
  0x1f   :  { %v62_v27 = vsub.f32 1.5, %v61_v26 }
  0x21   :  { %v63_v28 = vmul.f32 %v151_v23, %v62_v27 }
  0x23   :  { %v64_v30 = vmul.f32 %v63_v28, %v57_v22 }
  0x25   :  { %v66_v31 = vsel %vm65_vm0, %v57_v22, %v64_v30 }
  0x26   :  { %v69_v32 = vsel %vm67_vm1, %v68_v29, %v66_v31 }
  0x27   :  { %152 = vrcp.f32 %v69_v32  ;;  %v81_v35 = vand.u32 2147483648, %v69_v32  ;;  %vm75_vm2 = vweird.f32 %v69_v32  ;;  %v79_v37 = vand.u32 2147483647, %v69_v32 }
  0x29   :  { %v82_v39 = vor.u32 1.1754944e-38, %v81_v35  ;;  %vm80_vm5 = vcmp.eq.f32.partialorder %v79_v37, 8.507059e+37 }
  0x2d   :  { %v153_v33 = vpop.eup %152 }
  0x2e   :  { %v71_v34 = vmul.f32 %v153_v33, %v69_v32  ;;  %vm76_vm3 = vweird.f32 %v153_v33 }
  0x2f   :  { %vm77_vm4 = vmor %vm75_vm2, %vm76_vm3 }
  0x30   :  { %v72_v36 = vsub.f32 1.0, %v71_v34 }
  0x32   :  { %v73_v38 = vmul.f32 %v153_v33, %v72_v36 }
  0x34   :  { %v74_v41 = vadd.f32 %v153_v33, %v73_v38 }
  0x36   :  { %v78_v42 = vsel %vm77_vm4, %v153_v33, %v74_v41 }
  0x37   :  { %v83_v43 = vsel %vm80_vm5, %v82_v39, %v78_v42 }
  0x38   :  { %v84_v44 = vmul.f32 %v83_v43, %v48_v13  ;;  %v85_v45 = vmul.f32 %v83_v43, %v50_v15  ;;  %v86_v46 = vmul.f32 %v83_v43, %v52_v17 }
  0x3a   :  { %v87_v47 = vadd.f32 1.0, %v84_v44  ;;  %119 = vst [vmem:[#allocation5 + $0x30] sm:$0xff] %v85_v45 }
  0x3b   :  { %121 = vst [vmem:[#allocation5 + $0x38] sm:$0xff] %v86_v46 }
  0x3c   :  { %154 = vrcp.f32 %v87_v47  ;;  %v99_v50 = vand.u32 2147483648, %v87_v47  ;;  %vm93_vm6 = vweird.f32 %v87_v47  ;;  %v97_v52 = vand.u32 2147483647, %v87_v47 }
  0x3e   :  { %v100_v54 = vor.u32 1.1754944e-38, %v99_v50  ;;  %vm98_vm9 = vcmp.eq.f32.partialorder %v97_v52, 8.507059e+37 }
  0x42   :  { %v155_v48 = vpop.eup %154 }
  0x43   :  { %v89_v49 = vmul.f32 %v155_v48, %v87_v47  ;;  %vm94_vm7 = vweird.f32 %v155_v48 }
  0x44   :  { %vm95_vm8 = vmor %vm93_vm6, %vm94_vm7 }
  0x45   :  { %v90_v51 = vsub.f32 1.0, %v89_v49 }
  0x47   :  { %v91_v53 = vmul.f32 %v155_v48, %v90_v51 }
  0x49   :  { %v92_v55 = vadd.f32 %v155_v48, %v91_v53 }
  0x4b   :  { %v96_v56 = vsel %vm95_vm8, %v155_v48, %v92_v55 }
  0x4c   :  { %v101_v57 = vsel %vm98_vm9, %v100_v54, %v96_v56 }
  0x4d   :  { %v103_v58 = vmul.f32 %v101_v57, %v85_v45  ;;  %v104_v59 = vmul.f32 %v101_v57, %v86_v46 }
  0x4f   :  { %v106_v60 = vmul.f32 %v103_v58, %v85_v45  ;;  %v107_v61 = vmul.f32 %v104_v59, %v86_v46  ;;  %v105_v62 = vmul.f32 %v104_v59, %v85_v45 }
  0x51   :  { %v108_v63 = vadd.f32 %v107_v61, %v106_v60  ;;  %v112_v0 = vsub.f32 1.0, %v106_v60  ;;  %v115_v1 = vsub.f32 1.0, %v107_v61  ;;  %123 = vst [vmem:[#allocation5 + $0x40] sm:$0xff] %v105_v62 }
  0x53   :  { %v109_v2 = vsub.f32 1.0, %v108_v63  ;;  %114 = vst [vmem:[#allocation5 + $0x20] sm:$0xff] %v112_v0 }
  0x54   :  { %117 = vst [vmem:[#allocation5 + $0x28] sm:$0xff] %v115_v1 }
  0x55   :  { %111 = vst [vmem:[#allocation5 + $0x18] sm:$0xff] %v109_v2 }
  0x56   :  { %139 = dma.vmem_to_hbm [thread:$0]  %s132_s13, 1280, %s134_s16, [#allocation4], %s209_s11, %s209_s11, %s210_s12  }
  0x57   :  { %206 = dma.done.wait [#allocation4], 1280  }
  0x58   :  { %207 = vsyncadd [#allocation4], 4294966016 }
  0x59   :  { %144 = vsyncpa [#allocation3], 1 }
  0x5a   :  { %145 = vsyncpa [#allocation4], 1 }

</bundles_post_ra>
